<compile_context>
chip_gen: v7x
topology: tpu7x:2x2x1
jax: 0.10.0
libtpu: 0.0.40
codegen_flags: <defaults>
</compile_context>

<pallas_src>
import functools

import jax
import jax.numpy as jnp
from jax.experimental import pallas as pl
from jax.experimental.pallas import tpu as pltpu


# ---------------------------------------------------------------------------
# Kernels
# ---------------------------------------------------------------------------
def _linear_relu_kernel_fullk(x_ref, w_ref, b_ref, o_ref):
    """Fused y = relu(x @ w + b) with the whole K dim in one block."""
    x = x_ref[...]
    if x.dtype != w_ref.dtype:
        x = x.astype(w_ref.dtype)  # in-kernel cast: VPU op, hides under MXU
    y = jnp.dot(x, w_ref[...], preferred_element_type=jnp.float32)
    y = y + b_ref[...]             # bias broadcast over rows (f32)
    o_ref[...] = jnp.maximum(y, 0.0).astype(o_ref.dtype)


def _linear_relu_kernel_ksplit(x_ref, w_ref, b_ref, o_ref, acc_ref):
    """Fallback for very large K: accumulate over the K grid axis."""
    k = pl.program_id(2)

    @pl.when(k == 0)
    def _():
        acc_ref[...] = jnp.zeros_like(acc_ref)

    x = x_ref[...]
    if x.dtype != w_ref.dtype:
        x = x.astype(w_ref.dtype)
    acc_ref[...] += jnp.dot(x, w_ref[...], preferred_element_type=jnp.float32)

    @pl.when(k == pl.num_programs(2) - 1)
    def _():
        y = acc_ref[...] + b_ref[...]
        o_ref[...] = jnp.maximum(y, 0.0).astype(o_ref.dtype)


# ---------------------------------------------------------------------------
# Helpers
# ---------------------------------------------------------------------------
def _round_up(x, m):
    return ((x + m - 1) // m) * m


@functools.lru_cache(maxsize=None)
def _vmem_budget_bytes():
    """Generation-aware (budget, scoped-limit-cap) in bytes."""
    cap = None
    try:
        cap = int(pltpu.get_tpu_info().vmem_capacity_bytes)
    except Exception:
        cap = None
    if cap is None or cap <= 0:
        cap = 64 * 1024 * 1024  # conservative default
    if cap <= 64 * 1024 * 1024:
        # v7x-class: 64 MiB physical -> leave headroom for internal scratch.
        return 44 * 1024 * 1024, 48 * 1024 * 1024
    # v5e / v6e: 128 MiB physical -> raise well above the 16/32 MiB defaults.
    return 96 * 1024 * 1024, 110 * 1024 * 1024


@functools.lru_cache(maxsize=None)
def _single_buffer_mode():
    """pl.Buffered(1) if supported by the installed JAX, else None."""
    if not hasattr(pl, "Buffered"):
        return None
    try:
        try:
            mode = pl.Buffered(1)
        except TypeError:
            mode = pl.Buffered(buffer_count=1)
        # Probe that BlockSpec accepts the pipeline_mode kwarg.
        pl.BlockSpec((8, 128), lambda i: (i, 0), pipeline_mode=mode)
        return mode
    except Exception:
        return None


def _choose_tm(m, sub):
    """MXU-friendly row tile: single block for small M, 128/256 otherwise."""
    if m <= 256:
        return max(sub, _round_up(m, sub))
    if m <= 1024:
        return 128
    return 256


# ---------------------------------------------------------------------------
# Wrapper
# ---------------------------------------------------------------------------
def embedding_forward(x, w_t, b, *, n_out=None, out_dtype=jnp.float32):
    """y = relu(x @ w_t + b).

    x:   (..., K) activations (f32 or bf16; cast to w_t.dtype in-kernel).
    w_t: (Kp, Np) weight stored transposed (in_dim, out_dim); may be
         pre-padded with zeros to multiples of 128 and stored in bf16.
    b:   (1, Np) float32 bias (may be pre-padded with zeros).
    n_out: logical output dim (<= Np); defaults to w_t.shape[1].
    """
    orig_shape = x.shape
    K = orig_shape[-1]
    x2 = x.reshape(-1, K)
    M = x2.shape[0]
    Kw, Nw = w_t.shape
    if n_out is None:
        n_out = Nw
    b = jnp.asarray(b).reshape(1, Nw)

    x_bytes = jnp.dtype(x2.dtype).itemsize
    w_bytes = jnp.dtype(w_t.dtype).itemsize
    out_bytes = jnp.dtype(out_dtype).itemsize

    # ---- padding (weights are pre-padded at init, so these are no-ops) -----
    Kp = _round_up(max(K, Kw), 128)
    Np = _round_up(Nw, 128)
    if w_t.shape != (Kp, Np):
        w_t = jnp.pad(w_t, ((0, Kp - Kw), (0, Np - Nw)))
    if b.shape != (1, Np):
        b = jnp.pad(b, ((0, 0), (0, Np - Nw)))

    # ---- tile selection -----------------------------------------------------
    budget, limit_cap = _vmem_budget_bytes()
    sub = 16 if x_bytes == 2 else 8
    tm = _choose_tm(M, sub)
    Mp = _round_up(M, tm)

    def est_fullk(tm_, tn_):  # conservative: double-buffered x, w, out + bias
        return (2 * tm_ * Kp * x_bytes + 2 * Kp * tn_ * w_bytes
                + 2 * tm_ * tn_ * out_bytes + 2 * tn_ * 4)

    def est_split(tm_, tn_, tk_):
        return (2 * tm_ * tk_ * x_bytes + 2 * tk_ * tn_ * w_bytes
                + 2 * tm_ * tn_ * out_bytes + tm_ * tn_ * 4 + 2 * tn_ * 4)

    # Prefer tn == Np so the weight slab is streamed from HBM exactly once.
    tn_candidates = [Np] + [c for c in (1024, 512, 256, 128)
                            if c < Np and Np % c == 0]
    tn = next((c for c in tn_candidates if est_fullk(tm, c) <= budget), None)
    full_k = tn is not None
    tk = Kp
    if not full_k:
        tn = 256 if Np % 256 == 0 else 128
        tk = next((c for c in (2048, 1024, 512, 256)
                   if Kp % c == 0 and est_split(tm, tn, c) <= budget), 128)

    # Guarantee >= 2 output blocks so both v7x TensorCores get work.
    if full_k and (Mp // tm) * (Np // tn) == 1:
        if Np >= 256 and Np % 256 == 0:
            tn = Np // 2
        elif Mp >= 2 * sub and Mp % (2 * sub) == 0:
            tm = Mp // 2

    est = est_fullk(tm, tn) if full_k else est_split(tm, tn, tk)
    vmem_limit = int(min(limit_cap, max(32 * 1024 * 1024, int(est * 1.5))))

    # ---- pad activations only if actually needed ---------------------------
    if (Mp, Kp) != (M, K):
        x2 = jnp.pad(x2, ((0, Mp - M), (0, Kp - K)))

    if full_k:
        gm, gn = Mp // tm, Np // tn
        # If N is split and the weight is the larger operand, keep the weight
        # resident per column block: N axis outer, M axis inner.
        w_resident_order = (gn > 1) and (Kp * Np * w_bytes >= Mp * Kp * x_bytes)
        if w_resident_order:
            grid = (gn, gm)
            x_map = lambda j, i: (i, 0)
            w_map = lambda j, i: (0, j)
            b_map = lambda j, i: (0, j)
            o_map = lambda j, i: (i, j)
        else:
            grid = (gm, gn)
            x_map = lambda i, j: (i, 0)
            w_map = lambda i, j: (0, j)
            b_map = lambda i, j: (0, j)
            o_map = lambda i, j: (i, j)

        mode1 = _single_buffer_mode()

        def make_call(use_single_buffer):
            def spec(shape, imap, const_index):
                if use_single_buffer and const_index and mode1 is not None:
                    # Block index never changes -> one buffer is enough.
                    return pl.BlockSpec(shape, imap, pipeline_mode=mode1)
                return pl.BlockSpec(shape, imap)

            in_specs = [
                spec((tm, Kp), x_map, gm == 1),   # x row slab
                spec((Kp, tn), w_map, gn == 1),   # weight column slab
                pl.BlockSpec((1, tn), b_map),     # bias tile
            ]
            return pl.pallas_call(
                _linear_relu_kernel_fullk,
                out_shape=jax.ShapeDtypeStruct((Mp, Np), out_dtype),
                grid_spec=pltpu.PrefetchScalarGridSpec(
                    num_scalar_prefetch=0,
                    grid=grid,
                    in_specs=in_specs,
                    out_specs=pl.BlockSpec((tm, tn), o_map),
                ),
                compiler_params=pltpu.CompilerParams(
                    dimension_semantics=("parallel", "parallel"),
                    vmem_limit_bytes=vmem_limit,
                ),
            )

        try:
            out = make_call(True)(x2, w_t, b)
        except Exception:
            # Fallback if single-buffer pipeline_mode is not supported.
            out = make_call(False)(x2, w_t, b)
    else:
        # Fallback: K too large for VMEM -> accumulate over the K grid axis.
        grid = (Mp // tm, Np // tn, Kp // tk)
        out = pl.pallas_call(
            _linear_relu_kernel_ksplit,
            out_shape=jax.ShapeDtypeStruct((Mp, Np), out_dtype),
            grid_spec=pltpu.PrefetchScalarGridSpec(
                num_scalar_prefetch=0,
                grid=grid,
                in_specs=[
                    pl.BlockSpec((tm, tk), lambda i, j, k: (i, k)),
                    pl.BlockSpec((tk, tn), lambda i, j, k: (k, j)),
                    pl.BlockSpec((1, tn), lambda i, j, k: (0, j)),
                ],
                out_specs=pl.BlockSpec((tm, tn), lambda i, j, k: (i, j)),
                scratch_shapes=[pltpu.VMEM((tm, tn), jnp.float32)],
            ),
            compiler_params=pltpu.CompilerParams(
                dimension_semantics=("parallel", "parallel", "arbitrary"),
                vmem_limit_bytes=vmem_limit,
            ),
        )(x2, w_t, b)

    out = out[:M, :n_out]
    return out.reshape(orig_shape[:-1] + (n_out,))


class Embedding:
    """JAX/Pallas port of the PyTorch Embedding module: Linear(inpt, embed) + ReLU."""

    def __init__(self, inpt_dim=2048, embed_dim=512, *,
                 param_dtype=jnp.float32, key=jax.random.PRNGKey(42)):
        kw, kb = jax.random.split(key)
        # Match nn.Linear's default init U(-1/sqrt(in), 1/sqrt(in)).
        bound = 1.0 / (inpt_dim ** 0.5)
        self.inpt_dim = inpt_dim
        self.embed_dim = embed_dim
        Kp = _round_up(inpt_dim, 128)
        Np = _round_up(embed_dim, 128)
        w = jax.random.uniform(kw, (inpt_dim, embed_dim), jnp.float32,
                               minval=-bound, maxval=bound)
        bias = jax.random.uniform(kb, (1, embed_dim), jnp.float32,
                                  minval=-bound, maxval=bound)
        # Pre-pad to TPU-friendly shapes (zeros) and store the matmul operand
        # dtype at init (e.g. bf16 on any TPU gen) -> no per-call pad / cast.
        self.w_t = jnp.pad(
            w, ((0, Kp - inpt_dim), (0, Np - embed_dim))).astype(param_dtype)
        self.b = jnp.pad(bias, ((0, 0), (0, Np - embed_dim)))  # bias stays f32

    def __call__(self, x, out_dtype=jnp.float32):
        return embedding_forward(x, self.w_t, self.b,
                                 n_out=self.embed_dim, out_dtype=out_dtype)


if __name__ == "__main__":
    # Small shapes consistent with the module: (batch, inpt_dim) -> (batch, embed_dim)
    batch, inpt_dim, embed_dim = 8, 256, 128

    key = jax.random.PRNGKey(0)
    x = jax.random.normal(key, (batch, inpt_dim), jnp.float32)

    # f32-weight path: exact nn.Linear + ReLU semantics.
    model = Embedding(inpt_dim=inpt_dim, embed_dim=embed_dim)
    out = jax.block_until_ready(model(x))
    ref = jnp.maximum(
        x @ model.w_t[:inpt_dim, :embed_dim] + model.b[:, :embed_dim], 0.0)
    assert out.shape == (batch, embed_dim)
    assert jnp.allclose(out, ref, atol=1e-5, rtol=1e-5)

    # bf16-weight path (weights stored bf16 at init, x cast in-kernel,
    # f32 MXU accumulation and f32 bias/ReLU epilogue).
    model_bf = Embedding(inpt_dim=inpt_dim, embed_dim=embed_dim,
                         param_dtype=jnp.bfloat16)
    out_bf = jax.block_until_ready(model_bf(x))
    ref_bf = jnp.maximum(
        x @ model_bf.w_t[:inpt_dim, :embed_dim].astype(jnp.float32)
        + model_bf.b[:, :embed_dim], 0.0)
    assert out_bf.shape == (batch, embed_dim)
    assert jnp.max(jnp.abs(out_bf - ref_bf)) < 5e-2

    print("KERNEL_OK")
</pallas_src>

<mosaic_0001>
module attributes {stable_mosaic.version = 11 : i64} {
  func.func @_linear_relu_kernel_fullk(%arg0: i32, %arg1: i32, %arg2: memref<8x256xf32, #tpu.memory_space<vmem>>, %arg3: memref<256x128xf32, #tpu.memory_space<vmem>>, %arg4: memref<1x128xf32, #tpu.memory_space<vmem>>, %arg5: memref<8x128xf32, #tpu.memory_space<vmem>>) attributes {dimension_semantics = [#tpu.dimension_semantics<parallel>, #tpu.dimension_semantics<parallel>], iteration_bounds = array<i64: 1, 1>, scalar_prefetch = 0 : i64, scratch_operands = 0 : i64, tpu.core_type = #tpu.core_type<tc>, window_params = [{pipeline_mode = #tpu.pipeline_mode<synchronous>, transform_indices = @transform_0, window_bounds = array<i64: 8, 256>}, {pipeline_mode = #tpu.pipeline_mode<synchronous>, transform_indices = @transform_1, window_bounds = array<i64: 256, 128>}, {transform_indices = @transform_2, window_bounds = array<i64: 1, 128>}, {transform_indices = @transform_3, window_bounds = array<i64: 8, 128>}]} {
    %c0 = arith.constant 0 : index
    %c0_0 = arith.constant 0 : index
    %0 = vector.load %arg2[%c0, %c0_0] : memref<8x256xf32, #tpu.memory_space<vmem>>, vector<8x256xf32>
    %c0_1 = arith.constant 0 : index
    %c0_2 = arith.constant 0 : index
    %1 = vector.load %arg3[%c0_1, %c0_2] : memref<256x128xf32, #tpu.memory_space<vmem>>, vector<256x128xf32>
    %cst = arith.constant dense<0.000000e+00> : vector<8x128xf32>
    %2 = tpu.matmul %0, %1, %cst {dimension_numbers = #tpu.dot_dimension_numbers<[1], [0], [0], [1], [0, 0, 1, 1], [], []>} : vector<8x256xf32>, vector<256x128xf32>, vector<8x128xf32> -> vector<8x128xf32>
    %c0_3 = arith.constant 0 : index
    %c0_4 = arith.constant 0 : index
    %3 = vector.load %arg4[%c0_3, %c0_4] : memref<1x128xf32, #tpu.memory_space<vmem>>, vector<1x128xf32>
    %4 = vector.broadcast %3 : vector<1x128xf32> to vector<8x128xf32>
    %5 = arith.addf %2, %4 : vector<8x128xf32>
    %cst_5 = arith.constant 0.000000e+00 : f32
    %6 = vector.broadcast %cst_5 : f32 to vector<8x128xf32>
    %7 = arith.maximumf %5, %6 : vector<8x128xf32>
    %c0_6 = arith.constant 0 : index
    %c0_7 = arith.constant 0 : index
    %8 = vector.load %arg5[%c0_6, %c0_7] : memref<8x128xf32, #tpu.memory_space<vmem>>, vector<8x128xf32>
    tpu.vector_store %arg5[%c0_6, %c0_7], %7 {strides = array<i32>} : memref<8x128xf32, #tpu.memory_space<vmem>>, vector<8x128xf32>,
    return
  }
  func.func @transform_0(%arg0: i32, %arg1: i32) -> (i32, i32) {
    %c0_i32 = arith.constant 0 : i32
    %c0_i32_0 = arith.constant 0 : i32
    return %arg0, %c0_i32 : i32, i32
  }
  func.func @transform_1(%arg0: i32, %arg1: i32) -> (i32, i32) {
    %c0_i32 = arith.constant 0 : i32
    %c0_i32_0 = arith.constant 0 : i32
    return %c0_i32, %arg1 : i32, i32
  }
  func.func @transform_2(%arg0: i32, %arg1: i32) -> (i32, i32) {
    %c0_i32 = arith.constant 0 : i32
    %c0_i32_0 = arith.constant 0 : i32
    return %c0_i32, %arg1 : i32, i32
  }
  func.func @transform_3(%arg0: i32, %arg1: i32) -> (i32, i32) {
    %c0_i32 = arith.constant 0 : i32
    return %arg0, %arg1 : i32, i32
  }
}

module attributes {stable_mosaic.version = 11 : i64} {
  func.func @_linear_relu_kernel_fullk(%arg0: i32, %arg1: i32, %arg2: memref<8x256xf32, #tpu.memory_space<vmem>>, %arg3: memref<256x128xf32, #tpu.memory_space<vmem>>, %arg4: memref<1x128xf32, #tpu.memory_space<vmem>>, %arg5: memref<8x128xf32, #tpu.memory_space<vmem>>) attributes {dimension_semantics = [#tpu.dimension_semantics<parallel>, #tpu.dimension_semantics<parallel>], iteration_bounds = array<i64: 1, 1>, scalar_prefetch = 0 : i64, scratch_operands = 0 : i64, tpu.core_type = #tpu.core_type<tc>, window_params = [{transform_indices = @transform_0, window_bounds = array<i64: 8, 256>}, {transform_indices = @transform_1, window_bounds = array<i64: 256, 128>}, {transform_indices = @transform_2, window_bounds = array<i64: 1, 128>}, {transform_indices = @transform_3, window_bounds = array<i64: 8, 128>}]} {
    %c0 = arith.constant 0 : index
    %c0_0 = arith.constant 0 : index
    %0 = vector.load %arg2[%c0, %c0_0] : memref<8x256xf32, #tpu.memory_space<vmem>>, vector<8x256xf32>
    %c0_1 = arith.constant 0 : index
    %c0_2 = arith.constant 0 : index
    %1 = vector.load %arg3[%c0_1, %c0_2] : memref<256x128xf32, #tpu.memory_space<vmem>>, vector<256x128xf32>
    %cst = arith.constant dense<0.000000e+00> : vector<8x128xf32>
    %2 = tpu.matmul %0, %1, %cst {dimension_numbers = #tpu.dot_dimension_numbers<[1], [0], [0], [1], [0, 0, 1, 1], [], []>} : vector<8x256xf32>, vector<256x128xf32>, vector<8x128xf32> -> vector<8x128xf32>
    %c0_3 = arith.constant 0 : index
    %c0_4 = arith.constant 0 : index
    %3 = vector.load %arg4[%c0_3, %c0_4] : memref<1x128xf32, #tpu.memory_space<vmem>>, vector<1x128xf32>
    %4 = vector.broadcast %3 : vector<1x128xf32> to vector<8x128xf32>
    %5 = arith.addf %2, %4 : vector<8x128xf32>
    %cst_5 = arith.constant 0.000000e+00 : f32
    %6 = vector.broadcast %cst_5 : f32 to vector<8x128xf32>
    %7 = arith.maximumf %5, %6 : vector<8x128xf32>
    %c0_6 = arith.constant 0 : index
    %c0_7 = arith.constant 0 : index
    %8 = vector.load %arg5[%c0_6, %c0_7] : memref<8x128xf32, #tpu.memory_space<vmem>>, vector<8x128xf32>
    tpu.vector_store %arg5[%c0_6, %c0_7], %7 {strides = array<i32>} : memref<8x128xf32, #tpu.memory_space<vmem>>, vector<8x128xf32>,
    return
  }
  func.func @transform_0(%arg0: i32, %arg1: i32) -> (i32, i32) {
    %c0_i32 = arith.constant 0 : i32
    %c0_i32_0 = arith.constant 0 : i32
    return %arg0, %c0_i32 : i32, i32
  }
  func.func @transform_1(%arg0: i32, %arg1: i32) -> (i32, i32) {
    %c0_i32 = arith.constant 0 : i32
    %c0_i32_0 = arith.constant 0 : i32
    return %c0_i32, %arg1 : i32, i32
  }
  func.func @transform_2(%arg0: i32, %arg1: i32) -> (i32, i32) {
    %c0_i32 = arith.constant 0 : i32
    %c0_i32_0 = arith.constant 0 : i32
    return %c0_i32, %arg1 : i32, i32
  }
  func.func @transform_3(%arg0: i32, %arg1: i32) -> (i32, i32) {
    %c0_i32 = arith.constant 0 : i32
    return %arg0, %arg1 : i32, i32
  }
}

</mosaic_0001>

<bundles_post_ra>
// kernel: tpu_custom_call.1
= control target key start
LH: loop header
LB: loop body
LE: loop exit
PB: predicated region body
PF: predicated region fallthrough
CT: control target
= control target key end

     0   :  { %8 = vsyncpa [#allocation3], 0  ;;  %s386_s0 = inlined_call_operand.hbm [shape: f32[8,256], index: 0, kind: input, shape index: {}]   ;;  %s387_s1 = inlined_call_operand.hbm [shape: f32[256,128], index: 1, kind: input, shape index: {}]   ;;  %s388_s2 = inlined_call_operand.vmem [shape: f32[1,128], index: 2, kind: input, shape index: {}]   ;;  %s389_s3 = inlined_call_operand.hbm [shape: f32[8,128], index: 3, kind: output, shape index: {}]  }
   0x1   :  { %9 = vsyncpa [#allocation6], 0 }
   0x2   :  { %10 = vsyncpa [#allocation4], 0  ;;  %s315_s12 = smov [#allocation2]   ;;  %s316_s14 = smov [#allocation5]  }
   0x3   :  { %s17_s13 = sshll.u32 %s315_s12, 4  ;;  %s26_s15 = sshll.u32 %s316_s14, 4  ;;  %s18_s13 = int_to_ptr.vmem [resolvable:$true] %s17_s13  ;;  %s340_s15 = int_to_ptr.vmem [resolvable:$true] %s26_s15 }
   0x4   :  { %s243_s18 = scalar_lea.hbm %s386_s0, 256 }
   0x5   :  { %p244_p0 = scmp.ne.s32.totalorder %s386_s0, %s243_s18  ;;  %p247_p1 = scmp.lt.u32.totalorder %s243_s18, %s386_s0 }
   0x7   :  { %p249_p2 = pnand %p247_p1, %p244_p0 }
   0x9   :  { %252 = shalt.err (!%p249_p2)
}
   0xa   :  { %s253_s23 = scalar_lea.vmem %s18_s13, 256  ;;  %p258_p4 = scmp.lt.s32.totalorder %s18_s13, %s18_s13 }
   0xb   :  { %p254_p3 = scmp.ne.s32.totalorder %s18_s13, %s253_s23  ;;  %p259_p5 = scmp.lt.s32.totalorder %s253_s23, %s253_s23 }
   0xd   :  { %p260_p6 = por %p259_p5, %p258_p4 }
   0xf   :  { %p261_p7 = pnand %p260_p6, %p254_p3 }
  0x11   :  { %264 = shalt.err (!%p261_p7)
}
  0x12   :  { %20 = dma.hbm_to_vmem [thread:$0]  %s386_s0, 256, %s18_s13, [#allocation3]  }
  0x13   :  { %s265_s28 = scalar_lea.hbm %s387_s1, 4096 }
  0x14   :  { %p266_p8 = scmp.ne.s32.totalorder %s387_s1, %s265_s28  ;;  %p269_p9 = scmp.lt.u32.totalorder %s265_s28, %s387_s1 }
  0x16   :  { %p271_p10 = pnand %p269_p9, %p266_p8 }
  0x18   :  { %274 = shalt.err (!%p271_p10)
}
  0x19   :  { %s275_s6 = scalar_lea.vmem %s340_s15, 4096  ;;  %p280_p12 = scmp.lt.s32.totalorder %s340_s15, %s340_s15 }
  0x1a   :  { %p276_p11 = scmp.ne.s32.totalorder %s340_s15, %s275_s6  ;;  %p281_p13 = scmp.lt.s32.totalorder %s275_s6, %s275_s6 }
  0x1c   :  { %p282_p0 = por %p281_p13, %p280_p12 }
  0x1e   :  { %p283_p1 = pnand %p282_p0, %p276_p11 }
  0x20   :  { %286 = shalt.err (!%p283_p1)
}
  0x21   :  { %s317_s0 = smov 128   ;;  %s318_s7 = smov 8  }
  0x22   :  { %32 = dma.hbm_to_vmem [thread:$0]  %s387_s1, 4096, %s340_s15, [#allocation6], %s317_s0, %s317_s0, %s318_s7  }
  0x23   :  { %309 = dma.done.wait [#allocation3], 256  }
  0x24   :  { %310 = vsyncadd [#allocation3], 4294967040 }
  0x25   :  { %311 = dma.done.wait [#allocation6], 4096  }
  0x26   :  { %312 = vsyncadd [#allocation6], 4294963200  ;;  %v59_v0 = vld [vmem:[#allocation5 + $0x80] sm:$0xff]  ;;  %v60_v1 = vld [vmem:[#allocation5 + $0x88] sm:$0xff]  ;;  %s319_s11 = smov [#allocation7]  }
  0x27   :  { %v43_v2 = vld [vmem:[#allocation5] sm:$0xff]  ;;  %v206_v3 = vpack.c.bf16 %v60_v1, %v59_v0  ;;  %v44_v4 = vld [vmem:[#allocation5 + $0x8] sm:$0xff]  ;;  %v61_v5 = vld [vmem:[#allocation5 + $0x90] sm:$0xff]  ;;  %s160_s12 = sshll.u32 %s319_s11, 4  ;;  %s161_s12 = int_to_ptr.vmem [resolvable:$true] %s160_s12 }
  0x28   :  { %v62_v6 = vld [vmem:[#allocation5 + $0x98] sm:$0xff]  ;;  %v208_v7 = vpack.c.bf16 %v44_v4, %v43_v2  ;;  %v45_v9 = vld [vmem:[#allocation5 + $0x10] sm:$0xff]  ;;  %v63_v11 = vld [vmem:[#allocation5 + $0xa0] sm:$0xff]  ;;  %s287_s13 = scalar_lea.vmem %s161_s12, 128  ;;  %p292_p3 = scmp.lt.s32.totalorder %s161_s12, %s161_s12 }
  0x29   :  { %v210_v8 = vpack.c.bf16 %v62_v6, %v61_v5  ;;  %v46_v10 = vld [vmem:[#allocation5 + $0x18] sm:$0xff]  ;;  %207 = vmatprep.subr.bf16.mxu0 %v206_v3  ;;  %v64_v12 = vld [vmem:[#allocation5 + $0xa8] sm:$0xff]  ;;  %v47_v15 = vld [vmem:[#allocation5 + $0x20] sm:$0xff]  ;;  %p288_p2 = scmp.ne.s32.totalorder %s161_s12, %s287_s13  ;;  %p293_p4 = scmp.lt.s32.totalorder %s287_s13, %s287_s13 }
  0x2a   :  { %209 = vmatpush3.bf16.msra.mxu0 %v208_v7  ;;  %v212_v13 = vpack.c.bf16 %v46_v10, %v45_v9  ;;  %v214_v14 = vpack.c.bf16 %v64_v12, %v63_v11  ;;  %v48_v16 = vld [vmem:[#allocation5 + $0x28] sm:$0xff]  ;;  %v65_v17 = vld [vmem:[#allocation5 + $0xb0] sm:$0xff]  ;;  %v66_v18 = vld [vmem:[#allocation5 + $0xb8] sm:$0xff] }
  0x2b   :  { %211 = vmatprep.subr.bf16.mxu0 %v210_v8  ;;  %v216_v19 = vpack.c.bf16 %v48_v16, %v47_v15  ;;  %v218_v20 = vpack.c.bf16 %v66_v18, %v65_v17  ;;  %v49_v21 = vld [vmem:[#allocation5 + $0x30] sm:$0xff]  ;;  %v50_v22 = vld [vmem:[#allocation5 + $0x38] sm:$0xff]  ;;  %v67_v23 = vld [vmem:[#allocation5 + $0xc0] sm:$0xff]  ;;  %p294_p5 = por %p293_p4, %p292_p3 }
  0x2c   :  { %v68_v24 = vld [vmem:[#allocation5 + $0xc8] sm:$0xff]  ;;  %v42_v25 = vld [vmem:[#allocation2 + $0x8] sm:$0xff]  ;;  %v220_v26 = vpack.c.bf16 %v50_v22, %v49_v21  ;;  %v51_v28 = vld [vmem:[#allocation5 + $0x40] sm:$0xff] }
  0x2d   :  { %146 = vmatprep.mubr.f32.mxu0 %v42_v25  ;;  %v222_v27 = vpack.c.bf16 %v68_v24, %v67_v23  ;;  %v52_v29 = vld [vmem:[#allocation5 + $0x48] sm:$0xff]  ;;  %v69_v30 = vld [vmem:[#allocation5 + $0xd0] sm:$0xff]  ;;  %v70_v31 = vld [vmem:[#allocation5 + $0xd8] sm:$0xff]  ;;  %p295_p6 = pnand %p294_p5, %p288_p2 }
  0x2e   :  { %213 = vmatpush3.bf16.msra.mxu0 %v212_v13  ;;  %v224_v32 = vpack.c.bf16 %v52_v29, %v51_v28  ;;  %v226_v33 = vpack.c.bf16 %v70_v31, %v69_v30  ;;  %v53_v34 = vld [vmem:[#allocation5 + $0x50] sm:$0xff]  ;;  %v54_v35 = vld [vmem:[#allocation5 + $0x58] sm:$0xff]  ;;  %v71_v36 = vld [vmem:[#allocation5 + $0xe0] sm:$0xff] }
  0x2f   :  { %215 = vmatprep.subr.bf16.mxu0 %v214_v14  ;;  %v72_v37 = vld [vmem:[#allocation5 + $0xe8] sm:$0xff]  ;;  %v228_v38 = vpack.c.bf16 %v54_v35, %v53_v34  ;;  %v55_v40 = vld [vmem:[#allocation5 + $0x60] sm:$0xff]  ;;  %v73_v42 = vld [vmem:[#allocation5 + $0xf0] sm:$0xff] }
  0x30   :  { %v230_v39 = vpack.c.bf16 %v72_v37, %v71_v36  ;;  %v56_v41 = vld [vmem:[#allocation5 + $0x68] sm:$0xff]  ;;  %v74_v43 = vld [vmem:[#allocation5 + $0xf8] sm:$0xff]  ;;  %v57_v46 = vld [vmem:[#allocation5 + $0x70] sm:$0xff] }
  0x31   :  { %v232_v44 = vpack.c.bf16 %v56_v41, %v55_v40  ;;  %v234_v45 = vpack.c.bf16 %v74_v43, %v73_v42  ;;  %v58_v47 = vld [vmem:[#allocation5 + $0x78] sm:$0xff]  ;;  %v41_v49 = vld [vmem:[#allocation2] sm:$0xff] }
  0x32   :  { %217 = vmatpush3.bf16.msra.mxu0 %v216_v19  ;;  %v236_v48 = vpack.c.bf16 %v58_v47, %v57_v46  ;;  %v170_v51 = vld [vmem:[%s388_s2] ss:$0 sm:$0xff] }
  0x33   :  { %219 = vmatprep.subr.bf16.mxu0 %v218_v20 }
  0x36   :  { %221 = vmatpush3.bf16.msra.mxu0 %v220_v26 }
  0x37   :  { %223 = vmatprep.subr.bf16.mxu0 %v222_v27 }
  0x3a   :  { %225 = vmatpush3.bf16.msra.mxu0 %v224_v32 }
  0x3b   :  { %227 = vmatprep.subr.bf16.mxu0 %v226_v33 }
  0x3e   :  { %229 = vmatpush3.bf16.msra.mxu0 %v228_v38 }
  0x3f   :  { %231 = vmatprep.subr.bf16.mxu0 %v230_v39 }
  0x42   :  { %233 = vmatpush3.bf16.msra.mxu0 %v232_v44 }
  0x43   :  { %235 = vmatprep.subr.bf16.mxu0 %v234_v45 }
  0x46   :  { %237 = vmatpush3.bf16.msra.mxu0 %v236_v48 }
  0x49   :  { %147 = vmatmul.mubr.f32.vlgmr.msra.gmra.mrb[0].mxu0 %v41_v49 }
 0x11c   :  { %v203_v50 = vpop.f32.mrb[0].mxu0 }
 0x11d   :  { %v204_v52 = vpop.f32.mrb[1].mxu0 }
 0x11e   :  { %v205_v53 = vadd.f32 %v204_v52, %v203_v50 }
 0x120   :  { %v149_v54 = vadd.f32 %v205_v53, %v170_v51 }
 0x122   :  { %v152_v55 = vmax.f32 %v149_v54, 0.0 }
 0x124   :  { %153 = vst [vmem:[#allocation7] sm:$0xff] %v152_v55 }
 0x125   :  { %298 = shalt.err (!%p295_p6)
}
 0x126   :  { %s299_s16 = scalar_lea.hbm %s389_s3, 128 }
 0x127   :  { %p300_p7 = scmp.ne.s32.totalorder %s389_s3, %s299_s16  ;;  %p303_p8 = scmp.lt.u32.totalorder %s299_s16, %s389_s3 }
 0x129   :  { %p305_p9 = pnand %p303_p8, %p300_p7 }
 0x12b   :  { %308 = shalt.err (!%p305_p9)
}
 0x12c   :  { %163 = dma.vmem_to_hbm [thread:$0]  %s161_s12, 128, %s389_s3, [#allocation4]  }
 0x12d   :  { %313 = dma.done.wait [#allocation4], 128  }
 0x12e   :  { %314 = vsyncadd [#allocation4], 4294967168 }
 0x12f   :  { %167 = vsyncpa [#allocation3], 1 }
 0x130   :  { %168 = vsyncpa [#allocation6], 1 }
 0x131   :  { %169 = vsyncpa [#allocation4], 1 }

// kernel: tpu_custom_call.1
= control target key start
LH: loop header
LB: loop body
LE: loop exit
PB: predicated region body
PF: predicated region fallthrough
CT: control target
= control target key end

     0   :  { %8 = vsyncpa [#allocation3], 0  ;;  %s386_s0 = inlined_call_operand.hbm [shape: f32[8,256], index: 0, kind: input, shape index: {}]   ;;  %s387_s1 = inlined_call_operand.hbm [shape: f32[256,128], index: 1, kind: input, shape index: {}]   ;;  %s388_s2 = inlined_call_operand.vmem [shape: f32[1,128], index: 2, kind: input, shape index: {}]   ;;  %s389_s3 = inlined_call_operand.hbm [shape: f32[8,128], index: 3, kind: output, shape index: {}]  }
   0x1   :  { %9 = vsyncpa [#allocation6], 0 }
   0x2   :  { %10 = vsyncpa [#allocation4], 0  ;;  %s315_s12 = smov [#allocation2]   ;;  %s316_s14 = smov [#allocation5]  }
   0x3   :  { %s17_s13 = sshll.u32 %s315_s12, 4  ;;  %s26_s15 = sshll.u32 %s316_s14, 4  ;;  %s18_s13 = int_to_ptr.vmem [resolvable:$true] %s17_s13  ;;  %s340_s15 = int_to_ptr.vmem [resolvable:$true] %s26_s15 }
   0x4   :  { %s243_s18 = scalar_lea.hbm %s386_s0, 256 }
   0x5   :  { %p244_p0 = scmp.ne.s32.totalorder %s386_s0, %s243_s18  ;;  %p247_p1 = scmp.lt.u32.totalorder %s243_s18, %s386_s0 }
   0x7   :  { %p249_p2 = pnand %p247_p1, %p244_p0 }
   0x9   :  { %252 = shalt.err (!%p249_p2)
}
   0xa   :  { %s253_s23 = scalar_lea.vmem %s18_s13, 256  ;;  %p258_p4 = scmp.lt.s32.totalorder %s18_s13, %s18_s13 }
   0xb   :  { %p254_p3 = scmp.ne.s32.totalorder %s18_s13, %s253_s23  ;;  %p259_p5 = scmp.lt.s32.totalorder %s253_s23, %s253_s23 }
   0xd   :  { %p260_p6 = por %p259_p5, %p258_p4 }
   0xf   :  { %p261_p7 = pnand %p260_p6, %p254_p3 }
  0x11   :  { %264 = shalt.err (!%p261_p7)
}
  0x12   :  { %20 = dma.hbm_to_vmem [thread:$0]  %s386_s0, 256, %s18_s13, [#allocation3]  }
  0x13   :  { %s265_s28 = scalar_lea.hbm %s387_s1, 4096 }
  0x14   :  { %p266_p8 = scmp.ne.s32.totalorder %s387_s1, %s265_s28  ;;  %p269_p9 = scmp.lt.u32.totalorder %s265_s28, %s387_s1 }
  0x16   :  { %p271_p10 = pnand %p269_p9, %p266_p8 }
  0x18   :  { %274 = shalt.err (!%p271_p10)
}
  0x19   :  { %s275_s6 = scalar_lea.vmem %s340_s15, 4096  ;;  %p280_p12 = scmp.lt.s32.totalorder %s340_s15, %s340_s15 }
  0x1a   :  { %p276_p11 = scmp.ne.s32.totalorder %s340_s15, %s275_s6  ;;  %p281_p13 = scmp.lt.s32.totalorder %s275_s6, %s275_s6 }
  0x1c   :  { %p282_p0 = por %p281_p13, %p280_p12 }
  0x1e   :  { %p283_p1 = pnand %p282_p0, %p276_p11 }
  0x20   :  { %286 = shalt.err (!%p283_p1)
}
  0x21   :  { %s317_s0 = smov 128   ;;  %s318_s7 = smov 8  }
  0x22   :  { %32 = dma.hbm_to_vmem [thread:$0]  %s387_s1, 4096, %s340_s15, [#allocation6], %s317_s0, %s317_s0, %s318_s7  }
  0x23   :  { %309 = dma.done.wait [#allocation3], 256  }
  0x24   :  { %310 = vsyncadd [#allocation3], 4294967040 }
  0x25   :  { %311 = dma.done.wait [#allocation6], 4096  }
  0x26   :  { %312 = vsyncadd [#allocation6], 4294963200  ;;  %v59_v0 = vld [vmem:[#allocation5 + $0x80] sm:$0xff]  ;;  %v60_v1 = vld [vmem:[#allocation5 + $0x88] sm:$0xff]  ;;  %s319_s11 = smov [#allocation7]  }
  0x27   :  { %v43_v2 = vld [vmem:[#allocation5] sm:$0xff]  ;;  %v206_v3 = vpack.c.bf16 %v60_v1, %v59_v0  ;;  %v44_v4 = vld [vmem:[#allocation5 + $0x8] sm:$0xff]  ;;  %v61_v5 = vld [vmem:[#allocation5 + $0x90] sm:$0xff]  ;;  %s160_s12 = sshll.u32 %s319_s11, 4  ;;  %s161_s12 = int_to_ptr.vmem [resolvable:$true] %s160_s12 }
  0x28   :  { %v62_v6 = vld [vmem:[#allocation5 + $0x98] sm:$0xff]  ;;  %v208_v7 = vpack.c.bf16 %v44_v4, %v43_v2  ;;  %v45_v9 = vld [vmem:[#allocation5 + $0x10] sm:$0xff]  ;;  %v63_v11 = vld [vmem:[#allocation5 + $0xa0] sm:$0xff]  ;;  %s287_s13 = scalar_lea.vmem %s161_s12, 128  ;;  %p292_p3 = scmp.lt.s32.totalorder %s161_s12, %s161_s12 }
  0x29   :  { %v210_v8 = vpack.c.bf16 %v62_v6, %v61_v5  ;;  %v46_v10 = vld [vmem:[#allocation5 + $0x18] sm:$0xff]  ;;  %207 = vmatprep.subr.bf16.mxu0 %v206_v3  ;;  %v64_v12 = vld [vmem:[#allocation5 + $0xa8] sm:$0xff]  ;;  %v47_v15 = vld [vmem:[#allocation5 + $0x20] sm:$0xff]  ;;  %p288_p2 = scmp.ne.s32.totalorder %s161_s12, %s287_s13  ;;  %p293_p4 = scmp.lt.s32.totalorder %s287_s13, %s287_s13 }
  0x2a   :  { %209 = vmatpush3.bf16.msra.mxu0 %v208_v7  ;;  %v212_v13 = vpack.c.bf16 %v46_v10, %v45_v9  ;;  %v214_v14 = vpack.c.bf16 %v64_v12, %v63_v11  ;;  %v48_v16 = vld [vmem:[#allocation5 + $0x28] sm:$0xff]  ;;  %v65_v17 = vld [vmem:[#allocation5 + $0xb0] sm:$0xff]  ;;  %v66_v18 = vld [vmem:[#allocation5 + $0xb8] sm:$0xff] }
  0x2b   :  { %211 = vmatprep.subr.bf16.mxu0 %v210_v8  ;;  %v216_v19 = vpack.c.bf16 %v48_v16, %v47_v15  ;;  %v218_v20 = vpack.c.bf16 %v66_v18, %v65_v17  ;;  %v49_v21 = vld [vmem:[#allocation5 + $0x30] sm:$0xff]  ;;  %v50_v22 = vld [vmem:[#allocation5 + $0x38] sm:$0xff]  ;;  %v67_v23 = vld [vmem:[#allocation5 + $0xc0] sm:$0xff]  ;;  %p294_p5 = por %p293_p4, %p292_p3 }
  0x2c   :  { %v68_v24 = vld [vmem:[#allocation5 + $0xc8] sm:$0xff]  ;;  %v42_v25 = vld [vmem:[#allocation2 + $0x8] sm:$0xff]  ;;  %v220_v26 = vpack.c.bf16 %v50_v22, %v49_v21  ;;  %v51_v28 = vld [vmem:[#allocation5 + $0x40] sm:$0xff] }
  0x2d   :  { %146 = vmatprep.mubr.f32.mxu0 %v42_v25  ;;  %v222_v27 = vpack.c.bf16 %v68_v24, %v67_v23  ;;  %v52_v29 = vld [vmem:[#allocation5 + $0x48] sm:$0xff]  ;;  %v69_v30 = vld [vmem:[#allocation5 + $0xd0] sm:$0xff]  ;;  %v70_v31 = vld [vmem:[#allocation5 + $0xd8] sm:$0xff]  ;;  %p295_p6 = pnand %p294_p5, %p288_p2 }
  0x2e   :  { %213 = vmatpush3.bf16.msra.mxu0 %v212_v13  ;;  %v224_v32 = vpack.c.bf16 %v52_v29, %v51_v28  ;;  %v226_v33 = vpack.c.bf16 %v70_v31, %v69_v30  ;;  %v53_v34 = vld [vmem:[#allocation5 + $0x50] sm:$0xff]  ;;  %v54_v35 = vld [vmem:[#allocation5 + $0x58] sm:$0xff]  ;;  %v71_v36 = vld [vmem:[#allocation5 + $0xe0] sm:$0xff] }
  0x2f   :  { %215 = vmatprep.subr.bf16.mxu0 %v214_v14  ;;  %v72_v37 = vld [vmem:[#allocation5 + $0xe8] sm:$0xff]  ;;  %v228_v38 = vpack.c.bf16 %v54_v35, %v53_v34  ;;  %v55_v40 = vld [vmem:[#allocation5 + $0x60] sm:$0xff]  ;;  %v73_v42 = vld [vmem:[#allocation5 + $0xf0] sm:$0xff] }
  0x30   :  { %v230_v39 = vpack.c.bf16 %v72_v37, %v71_v36  ;;  %v56_v41 = vld [vmem:[#allocation5 + $0x68] sm:$0xff]  ;;  %v74_v43 = vld [vmem:[#allocation5 + $0xf8] sm:$0xff]  ;;  %v57_v46 = vld [vmem:[#allocation5 + $0x70] sm:$0xff] }
  0x31   :  { %v232_v44 = vpack.c.bf16 %v56_v41, %v55_v40  ;;  %v234_v45 = vpack.c.bf16 %v74_v43, %v73_v42  ;;  %v58_v47 = vld [vmem:[#allocation5 + $0x78] sm:$0xff]  ;;  %v41_v49 = vld [vmem:[#allocation2] sm:$0xff] }
  0x32   :  { %217 = vmatpush3.bf16.msra.mxu0 %v216_v19  ;;  %v236_v48 = vpack.c.bf16 %v58_v47, %v57_v46  ;;  %v170_v51 = vld [vmem:[%s388_s2] ss:$0 sm:$0xff] }
  0x33   :  { %219 = vmatprep.subr.bf16.mxu0 %v218_v20 }
  0x36   :  { %221 = vmatpush3.bf16.msra.mxu0 %v220_v26 }
  0x37   :  { %223 = vmatprep.subr.bf16.mxu0 %v222_v27 }
  0x3a   :  { %225 = vmatpush3.bf16.msra.mxu0 %v224_v32 }
  0x3b   :  { %227 = vmatprep.subr.bf16.mxu0 %v226_v33 }
  0x3e   :  { %229 = vmatpush3.bf16.msra.mxu0 %v228_v38 }
  0x3f   :  { %231 = vmatprep.subr.bf16.mxu0 %v230_v39 }
  0x42   :  { %233 = vmatpush3.bf16.msra.mxu0 %v232_v44 }
  0x43   :  { %235 = vmatprep.subr.bf16.mxu0 %v234_v45 }
  0x46   :  { %237 = vmatpush3.bf16.msra.mxu0 %v236_v48 }
  0x49   :  { %147 = vmatmul.mubr.f32.vlgmr.msra.gmra.mrb[0].mxu0 %v41_v49 }
 0x11c   :  { %v203_v50 = vpop.f32.mrb[0].mxu0 }
 0x11d   :  { %v204_v52 = vpop.f32.mrb[1].mxu0 }
 0x11e   :  { %v205_v53 = vadd.f32 %v204_v52, %v203_v50 }
 0x120   :  { %v149_v54 = vadd.f32 %v205_v53, %v170_v51 }
 0x122   :  { %v152_v55 = vmax.f32 %v149_v54, 0.0 }
 0x124   :  { %153 = vst [vmem:[#allocation7] sm:$0xff] %v152_v55 }
 0x125   :  { %298 = shalt.err (!%p295_p6)
}
 0x126   :  { %s299_s16 = scalar_lea.hbm %s389_s3, 128 }
 0x127   :  { %p300_p7 = scmp.ne.s32.totalorder %s389_s3, %s299_s16  ;;  %p303_p8 = scmp.lt.u32.totalorder %s299_s16, %s389_s3 }
 0x129   :  { %p305_p9 = pnand %p303_p8, %p300_p7 }
 0x12b   :  { %308 = shalt.err (!%p305_p9)
}
 0x12c   :  { %163 = dma.vmem_to_hbm [thread:$0]  %s161_s12, 128, %s389_s3, [#allocation4]  }
 0x12d   :  { %313 = dma.done.wait [#allocation4], 128  }
 0x12e   :  { %314 = vsyncadd [#allocation4], 4294967168 }
 0x12f   :  { %167 = vsyncpa [#allocation3], 1 }
 0x130   :  { %168 = vsyncpa [#allocation6], 1 }
 0x131   :  { %169 = vsyncpa [#allocation4], 1 }

</bundles_post_ra>
